<compile_context>
chip_gen: v6e
topology: v6e:2x2x1
jax: 0.10.0
libtpu: 0.0.40
codegen_flags: <defaults>
</compile_context>

<pallas_src>
import jax
import jax.numpy as jnp
from jax.experimental import pallas as pl
from jax.experimental.pallas import tpu as pltpu


def _round_up(x, m):
    return (x + m - 1) // m * m


def _cat_linear_kernel(off_ref, idx_ref, table_ref, bias_ref, out_ref, acc_ref):
    """One (TB, TV) grid step: acc += counts(TB,TV) @ table_tile(TV,Dp)."""
    v = pl.program_id(1)

    @pl.when(v == 0)
    def _init():
        acc_ref[...] = jnp.zeros_like(acc_ref)

    tb, f_dim = idx_ref.shape
    tv = table_ref.shape[0]

    # Vocabulary ids covered by this V tile (iota offset by the tile base).
    v_base = v * tv
    vocab_ids = jax.lax.broadcasted_iota(jnp.int32, (1, tv), 1) + v_base      # (1, TV)

    # counts[b, j] = #{f : x_cat[b, f] + offsets[f] == v_base + j}
    # Unrolled loop over the small, static feature dim -- peak live data is one
    # (TB, TV) f32 tile, not a (TB, F, TV) one-hot.
    counts = jnp.zeros((tb, tv), jnp.float32)
    for f in range(f_dim):
        idx_f = idx_ref[:, f : f + 1] + off_ref[f]                            # (TB, 1)
        counts = counts + (idx_f == vocab_ids).astype(jnp.float32)

    # MXU: bf16 operands, f32 accumulation (counts <= F are exact in bf16).
    acc_ref[...] += jnp.dot(
        counts.astype(jnp.bfloat16), table_ref[...],
        preferred_element_type=jnp.float32)

    @pl.when(v == pl.num_programs(1) - 1)
    def _finalize():
        out_ref[...] = acc_ref[...] + bias_ref[...]


def cat_linear(x_cat, offsets, table, bias, *, tile_b=256, tile_v=512,
               vmem_limit_bytes=32 * 1024 * 1024):
    """CatLinear forward: sum of embedding rows over features plus bias."""
    B, F = x_cat.shape
    V, D = table.shape
    LANE = 128

    tile_b = _round_up(min(tile_b, B), 8)
    tile_v = _round_up(min(tile_v, V), 8)
    Bp = _round_up(B, tile_b)
    Vp = _round_up(V, tile_v)
    Dp = _round_up(D, LANE)           # lane-dense output block

    # Padding: extra batch rows use index 0 (valid; results sliced off), extra vocab
    # rows are zero (never matched by any shifted index), extra output columns are zero.
    idx = jnp.zeros((Bp, F), jnp.int32).at[:B].set(x_cat.astype(jnp.int32))
    table_p = jnp.zeros((Vp, Dp), jnp.float32).at[:V, :D].set(table.astype(jnp.float32))
    table_bf16 = table_p.astype(jnp.bfloat16)          # bf16 table: half the HBM/VMEM bytes
    bias_p = jnp.zeros((1, Dp), jnp.float32).at[0, :D].set(bias.astype(jnp.float32))
    offs = offsets.reshape(F).astype(jnp.int32)        # -> SMEM via scalar prefetch

    grid = (Bp // tile_b, Vp // tile_v)                # B parallel, V reduction (last)

    out_padded = pl.pallas_call(
        _cat_linear_kernel,
        out_shape=jax.ShapeDtypeStruct((Bp, Dp), jnp.float32),
        grid_spec=pltpu.PrefetchScalarGridSpec(
            num_scalar_prefetch=1,                     # offsets -> SMEM, free for index_maps
            grid=grid,
            in_specs=[
                pl.BlockSpec((tile_b, F), lambda b, v, off: (b, 0)),   # x_cat tile
                pl.BlockSpec((tile_v, Dp), lambda b, v, off: (v, 0)),  # table tile
                pl.BlockSpec((1, Dp), lambda b, v, off: (0, 0)),       # bias
            ],
            out_specs=pl.BlockSpec((tile_b, Dp), lambda b, v, off: (b, 0)),
            scratch_shapes=[pltpu.VMEM((tile_b, Dp), jnp.float32)],    # f32 accumulator
        ),
        compiler_params=pltpu.CompilerParams(
            dimension_semantics=("parallel", "arbitrary"),
            vmem_limit_bytes=vmem_limit_bytes,         # sized to fit v7x's 64 MiB VMEM
        ),
    )(offs, idx, table_bf16, bias_p)

    return out_padded[:B, :D]


def cat_linear_reference(x_cat, offsets, table, bias):
    """Pure-JAX reference (gather + feature-sum)."""
    idx = x_cat + offsets[None, :]
    emb = jnp.take(table, idx, axis=0)                 # (B, F, D)
    return jnp.sum(emb, axis=1) + bias[None, :]


if __name__ == "__main__":
    key = jax.random.PRNGKey(0)

    # Small synthetic config consistent with CatLinear(categories, d_out).
    categories = [67, 41, 93, 55, 120]   # num_features = 5, vocab = 376
    d_out = 3
    batch = 256

    num_features = len(categories)
    vocab = sum(categories)

    # offsets = cumsum([0] + categories[:-1])
    offsets = jnp.cumsum(jnp.array([0] + categories[:-1], dtype=jnp.int32)).astype(jnp.int32)

    # Deterministic parameter init: xavier_uniform for the embedding, zeros for bias.
    k_w, k_x = jax.random.split(key)
    bound = (6.0 / (vocab + d_out)) ** 0.5
    table = jax.random.uniform(k_w, (vocab, d_out), jnp.float32, -bound, bound)
    bias = jnp.zeros((d_out,), jnp.float32)

    # Deterministic integer inputs: x_cat[b, f] in [0, categories[f]).
    maxvals = jnp.array(categories, dtype=jnp.int32)[None, :]
    raw = jax.random.randint(k_x, (batch, num_features), 0, 1 << 20, dtype=jnp.int32)
    x_cat = raw % maxvals

    # tile_b=128 / tile_v=128 -> grid (2, 3): exercises both the parallel B axis and
    # the accumulated V reduction.
    out = cat_linear(x_cat, offsets, table, bias, tile_b=128, tile_v=128)
    out = jax.block_until_ready(out)

    # The kernel feeds the MXU bf16 table tiles; compare against the bf16-rounded table
    # (counts are exact, so this check is tight).
    table_rounded = table.astype(jnp.bfloat16).astype(jnp.float32)
    ref = cat_linear_reference(x_cat, offsets, table_rounded, bias)

    assert out.shape == (batch, d_out)
    assert jnp.allclose(out, ref, atol=1e-4, rtol=1e-4), (out, ref)

    print("KERNEL_OK")
</pallas_src>

<mosaic_0001>
module attributes {stable_mosaic.version = 11 : i64} {
  func.func @_cat_linear_kernel(%arg0: i32, %arg1: i32, %arg2: memref<5xi32, #tpu.memory_space<smem>>, %arg3: memref<128x5xi32, #tpu.memory_space<vmem>>, %arg4: memref<128x128xbf16, #tpu.memory_space<vmem>>, %arg5: memref<1x128xf32, #tpu.memory_space<vmem>>, %arg6: memref<128x128xf32, #tpu.memory_space<vmem>>, %arg7: memref<128x128xf32, #tpu.memory_space<vmem>>) attributes {dimension_semantics = [#tpu.dimension_semantics<parallel>, #tpu.dimension_semantics<arbitrary>], iteration_bounds = array<i64: 2, 3>, scalar_prefetch = 1 : i64, scratch_operands = 1 : i64, tpu.core_type = #tpu.core_type<tc>, window_params = [{transform_indices = @transform_0, window_bounds = array<i64: 128, 5>}, {transform_indices = @transform_1, window_bounds = array<i64: 128, 128>}, {pipeline_mode = #tpu.pipeline_mode<synchronous>, transform_indices = @transform_2, window_bounds = array<i64: 1, 128>}, {transform_indices = @transform_3, window_bounds = array<i64: 128, 128>}]} {
    %c0_i32 = arith.constant 0 : i32
    %0 = arith.cmpi eq, %arg1, %c0_i32 : i32
    %1 = arith.extui %0 : i1 to i32
    %c0_i32_0 = arith.constant 0 : i32
    %2 = arith.cmpi ne, %1, %c0_i32_0 : i32
    scf.if %2 {
      %cst_19 = arith.constant 0.000000e+00 : f32
      %67 = vector.broadcast %cst_19 : f32 to vector<128x128xf32>
      %c0_20 = arith.constant 0 : index
      %c0_21 = arith.constant 0 : index
      %68 = vector.load %arg7[%c0_20, %c0_21] : memref<128x128xf32, #tpu.memory_space<vmem>>, vector<128x128xf32>
      tpu.vector_store %arg7[%c0_20, %c0_21], %67 {strides = array<i32>} : memref<128x128xf32, #tpu.memory_space<vmem>>, vector<128x128xf32>,
    } else {
    }
    %c128_i32 = arith.constant 128 : i32
    %3 = arith.muli %arg1, %c128_i32 : i32
    %4 = tpu.iota {dimensions = array<i32: 1>} : vector<1x128xi32>
    %5 = vector.broadcast %3 : i32 to vector<1x128xi32>
    %6 = arith.addi %4, %5 : vector<1x128xi32>
    %cst = arith.constant 0.000000e+00 : f32
    %7 = vector.broadcast %cst : f32 to vector<128x128xf32>
    %c0 = arith.constant 0 : index
    %c0_1 = arith.constant 0 : index
    %8 = vector.load %arg3[%c0, %c0_1] : memref<128x5xi32, #tpu.memory_space<vmem>>, vector<128x1xi32>
    %c0_2 = arith.constant 0 : index
    %9 = memref.load %arg2[%c0_2] : memref<5xi32, #tpu.memory_space<smem>>
    %10 = vector.broadcast %9 : i32 to vector<128x1xi32>
    %11 = arith.addi %8, %10 : vector<128x1xi32>
    %12 = vector.broadcast %11 : vector<128x1xi32> to vector<128x128xi32>
    %13 = vector.broadcast %6 : vector<1x128xi32> to vector<128x128xi32>
    %14 = arith.cmpi eq, %12, %13 : vector<128x128xi32>
    %15 = arith.extui %14 : vector<128x128xi1> to vector<128x128xi32>
    %16 = arith.sitofp %15 : vector<128x128xi32> to vector<128x128xf32>
    %17 = arith.addf %7, %16 : vector<128x128xf32>
    %c0_3 = arith.constant 0 : index
    %c1 = arith.constant 1 : index
    %18 = vector.load %arg3[%c0_3, %c1] : memref<128x5xi32, #tpu.memory_space<vmem>>, vector<128x1xi32>
    %c1_4 = arith.constant 1 : index
    %19 = memref.load %arg2[%c1_4] : memref<5xi32, #tpu.memory_space<smem>>
    %20 = vector.broadcast %19 : i32 to vector<128x1xi32>
    %21 = arith.addi %18, %20 : vector<128x1xi32>
    %22 = vector.broadcast %21 : vector<128x1xi32> to vector<128x128xi32>
    %23 = vector.broadcast %6 : vector<1x128xi32> to vector<128x128xi32>
    %24 = arith.cmpi eq, %22, %23 : vector<128x128xi32>
    %25 = arith.extui %24 : vector<128x128xi1> to vector<128x128xi32>
    %26 = arith.sitofp %25 : vector<128x128xi32> to vector<128x128xf32>
    %27 = arith.addf %17, %26 : vector<128x128xf32>
    %c0_5 = arith.constant 0 : index
    %c2 = arith.constant 2 : index
    %28 = vector.load %arg3[%c0_5, %c2] : memref<128x5xi32, #tpu.memory_space<vmem>>, vector<128x1xi32>
    %c2_6 = arith.constant 2 : index
    %29 = memref.load %arg2[%c2_6] : memref<5xi32, #tpu.memory_space<smem>>
    %30 = vector.broadcast %29 : i32 to vector<128x1xi32>
    %31 = arith.addi %28, %30 : vector<128x1xi32>
    %32 = vector.broadcast %31 : vector<128x1xi32> to vector<128x128xi32>
    %33 = vector.broadcast %6 : vector<1x128xi32> to vector<128x128xi32>
    %34 = arith.cmpi eq, %32, %33 : vector<128x128xi32>
    %35 = arith.extui %34 : vector<128x128xi1> to vector<128x128xi32>
    %36 = arith.sitofp %35 : vector<128x128xi32> to vector<128x128xf32>
    %37 = arith.addf %27, %36 : vector<128x128xf32>
    %c0_7 = arith.constant 0 : index
    %c3 = arith.constant 3 : index
    %38 = vector.load %arg3[%c0_7, %c3] : memref<128x5xi32, #tpu.memory_space<vmem>>, vector<128x1xi32>
    %c3_8 = arith.constant 3 : index
    %39 = memref.load %arg2[%c3_8] : memref<5xi32, #tpu.memory_space<smem>>
    %40 = vector.broadcast %39 : i32 to vector<128x1xi32>
    %41 = arith.addi %38, %40 : vector<128x1xi32>
    %42 = vector.broadcast %41 : vector<128x1xi32> to vector<128x128xi32>
    %43 = vector.broadcast %6 : vector<1x128xi32> to vector<128x128xi32>
    %44 = arith.cmpi eq, %42, %43 : vector<128x128xi32>
    %45 = arith.extui %44 : vector<128x128xi1> to vector<128x128xi32>
    %46 = arith.sitofp %45 : vector<128x128xi32> to vector<128x128xf32>
    %47 = arith.addf %37, %46 : vector<128x128xf32>
    %c0_9 = arith.constant 0 : index
    %c4 = arith.constant 4 : index
    %48 = vector.load %arg3[%c0_9, %c4] : memref<128x5xi32, #tpu.memory_space<vmem>>, vector<128x1xi32>
    %c4_10 = arith.constant 4 : index
    %49 = memref.load %arg2[%c4_10] : memref<5xi32, #tpu.memory_space<smem>>
    %50 = vector.broadcast %49 : i32 to vector<128x1xi32>
    %51 = arith.addi %48, %50 : vector<128x1xi32>
    %52 = vector.broadcast %51 : vector<128x1xi32> to vector<128x128xi32>
    %53 = vector.broadcast %6 : vector<1x128xi32> to vector<128x128xi32>
    %54 = arith.cmpi eq, %52, %53 : vector<128x128xi32>
    %55 = arith.extui %54 : vector<128x128xi1> to vector<128x128xi32>
    %56 = arith.sitofp %55 : vector<128x128xi32> to vector<128x128xf32>
    %57 = arith.addf %47, %56 : vector<128x128xf32>
    %c0_11 = arith.constant 0 : index
    %c0_12 = arith.constant 0 : index
    %58 = vector.load %arg7[%c0_11, %c0_12] : memref<128x128xf32, #tpu.memory_space<vmem>>, vector<128x128xf32>
    %59 = arith.truncf %57 : vector<128x128xf32> to vector<128x128xbf16>
    %c0_13 = arith.constant 0 : index
    %c0_14 = arith.constant 0 : index
    %60 = vector.load %arg4[%c0_13, %c0_14] : memref<128x128xbf16, #tpu.memory_space<vmem>>, vector<128x128xbf16>
    %cst_15 = arith.constant dense<0.000000e+00> : vector<128x128xf32>
    %61 = tpu.matmul %59, %60, %cst_15 {dimension_numbers = #tpu.dot_dimension_numbers<[1], [0], [0], [1], [0, 0, 1, 1], [], []>} : vector<128x128xbf16>, vector<128x128xbf16>, vector<128x128xf32> -> vector<128x128xf32>
    %62 = arith.addf %58, %61 : vector<128x128xf32>
    %c0_16 = arith.constant 0 : index
    %c0_17 = arith.constant 0 : index
    %63 = vector.load %arg7[%c0_16, %c0_17] : memref<128x128xf32, #tpu.memory_space<vmem>>, vector<128x128xf32>
    tpu.vector_store %arg7[%c0_16, %c0_17], %62 {strides = array<i32>} : memref<128x128xf32, #tpu.memory_space<vmem>>, vector<128x128xf32>,
    %c2_i32 = arith.constant 2 : i32
    %64 = arith.cmpi eq, %arg1, %c2_i32 : i32
    %65 = arith.extui %64 : i1 to i32
    %c0_i32_18 = arith.constant 0 : i32
    %66 = arith.cmpi ne, %65, %c0_i32_18 : i32
    scf.if %66 {
      %c0_19 = arith.constant 0 : index
      %c0_20 = arith.constant 0 : index
      %67 = vector.load %arg7[%c0_19, %c0_20] : memref<128x128xf32, #tpu.memory_space<vmem>>, vector<128x128xf32>
      %c0_21 = arith.constant 0 : index
      %c0_22 = arith.constant 0 : index
      %68 = vector.load %arg5[%c0_21, %c0_22] : memref<1x128xf32, #tpu.memory_space<vmem>>, vector<1x128xf32>
      %69 = vector.broadcast %68 : vector<1x128xf32> to vector<128x128xf32>
      %70 = arith.addf %67, %69 : vector<128x128xf32>
      %c0_23 = arith.constant 0 : index
      %c0_24 = arith.constant 0 : index
      %71 = vector.load %arg6[%c0_23, %c0_24] : memref<128x128xf32, #tpu.memory_space<vmem>>, vector<128x128xf32>
      tpu.vector_store %arg6[%c0_23, %c0_24], %70 {strides = array<i32>} : memref<128x128xf32, #tpu.memory_space<vmem>>, vector<128x128xf32>,
    } else {
    }
    return
  }
  func.func @transform_0(%arg0: i32, %arg1: i32, %arg2: memref<5xi32, #tpu.memory_space<smem>>) -> (i32, i32) {
    %c0_i32 = arith.constant 0 : i32
    %c0_i32_0 = arith.constant 0 : i32
    return %arg0, %c0_i32 : i32, i32
  }
  func.func @transform_1(%arg0: i32, %arg1: i32, %arg2: memref<5xi32, #tpu.memory_space<smem>>) -> (i32, i32) {
    %c0_i32 = arith.constant 0 : i32
    %c0_i32_0 = arith.constant 0 : i32
    return %arg1, %c0_i32 : i32, i32
  }
  func.func @transform_2(%arg0: i32, %arg1: i32, %arg2: memref<5xi32, #tpu.memory_space<smem>>) -> (i32, i32) {
    %c0_i32 = arith.constant 0 : i32
    %c0_i32_0 = arith.constant 0 : i32
    %c0_i32_1 = arith.constant 0 : i32
    return %c0_i32, %c0_i32_0 : i32, i32
  }
  func.func @transform_3(%arg0: i32, %arg1: i32, %arg2: memref<5xi32, #tpu.memory_space<smem>>) -> (i32, i32) {
    %c0_i32 = arith.constant 0 : i32
    %c0_i32_0 = arith.constant 0 : i32
    return %arg0, %c0_i32 : i32, i32
  }
}

</mosaic_0001>

<bundles_post_ra>
// kernel: tpu_custom_call.1
= control target key start
LH: loop header
LB: loop body
LE: loop exit
PB: predicated region body
PF: predicated region fallthrough
CT: control target
= control target key end

     0   :  { %s2474_s0 = inlined_call_operand.vmem [shape: s32[5], index: 0, kind: input, shape index: {}]   ;;  %s2475_s1 = inlined_call_operand.vmem [shape: s32[256,5], index: 1, kind: input, shape index: {}]   ;;  %s2476_s2 = inlined_call_operand.vmem [shape: bf16[384,128], index: 2, kind: input, shape index: {}]   ;;  %s2477_s3 = inlined_call_operand.vmem [shape: f32[1,128], index: 3, kind: input, shape index: {}]   ;;  %s2478_s4 = inlined_call_operand.hbm [shape: f32[256,128], index: 4, kind: output, shape index: {}]  }
   0x1   :  { %s9_s17 = sshll.u32 %s2474_s0, 4  ;;  %s10_s17 = int_to_ptr.vmem [resolvable:$true] %s9_s17 }
   0x2   :  { %s1564_s18 = scalar_lea.vmem %s10_s17, 16  ;;  %p1569_p1 = scmp.lt.s32.totalorder %s10_s17, %s10_s17 }
   0x3   :  { %p1565_p0 = scmp.ne.s32.totalorder %s10_s17, %s1564_s18  ;;  %p1570_p2 = scmp.lt.s32.totalorder %s1564_s18, %s1564_s18 }
   0x5   :  { %p1571_p3 = por %p1570_p2, %p1569_p1 }
   0x7   :  { %p1572_p4 = pnand %p1571_p3, %p1565_p0 }
   0x9   :  { %1575 = shalt.err (!%p1572_p4)  }
   0xa   :  { %s1672_s19 = smov [#allocation4]  }
   0xb   :  { %12 = dma.vmem_to_smem %s10_s17, 16, %s1672_s19, [#allocation3] }
   0xc   :  { %1634 = dma.done.wait [#allocation3], 16 }
   0xd   :  { %1635 = vsyncadd [#allocation3], 4294967280 }
   0xe   :  { %14 = sfence }
   0xf   :  { %15 = vsyncpa [#allocation6], 0 }
  0x10   :  { %17 = vsyncpa [#allocation6 + $0x1], 0  ;;  %s1711_s20 = smov 0   ;;  %s1713_s21 = smov 0  }
  0x11   :  { %s1715_s0 = smov 0   ;;  %s1717_s22 = smov 0  }
  0x12   :  { %s1719_s23 = smov 0   ;;  %s1721_s24 = smov 0  }
  0x13   :  { %s1723_s25 = smov 0   ;;  %s1725_s26 = smov 0  }
  0x14 LB: > { %s1280_s27 = sadd.s32 4294967295, %s1670_s26   ;;  %s1281_s28 = sadd.s32 4294967294, %s1670_s26   ;;  %s1670_s26 = sphi %s1725_s26, %s23_s26   ;;  %s1666_s25 = sphi %s1723_s25, %s2487_s25   ;;  %s1662_s24 = sphi %s1721_s24, %s2486_s24   ;;  %s1658_s23 = sphi %s1719_s23, %s2485_s23   ;;  %s1654_s22 = sphi %s1717_s22, %s2484_s22   ;;  %s1650_s0 = sphi %s1715_s0, %s2483_s0   ;;  %s1646_s21 = sphi %s1713_s21, %s2482_s21   ;;  %s1642_s20 = sphi %s1711_s20, %s2481_s20  }
  0x15   : > { %s32_s29 = sadd.s32 1, %s1662_s24  ;;  %s35_s30 = sadd.s32 1, %s1666_s25 }
  0x16   : > { %p33_p5 = scmp.ge.s32.totalorder %s32_s29, 3  ;;  %p125_p6 = scmp.ne.s32.totalorder %s1650_s0, %s1646_s21 }
  0x17   : > { %p126_p7 = scmp.eq.s32.totalorder %s1280_s27, 5  ;;  %p131_p9 = scmp.ne.s32.totalorder %s1646_s21, %s1642_s20 }
  0x18   : > { %s2489_s29 = smov (%p33_p5, %s32_s29), 0  ;;  %s2491_s30 = smov (!%p33_p5, %s35_s30), %s1666_s25 }
  0x19   : > { %p1760_p8 = por %p126_p7, %p125_p6  ;;  %p37_p10 = scmp.ge.s32.totalorder %s2491_s30, 2 }
  0x1a   : > { %p132_p11 = scmp.eq.s32.totalorder %s1281_s28, 5  ;;  %p1284_p12 = scmp.ge.s32.totalorder %s1670_s26, 1 }
  0x1b   : > { %p171_p13 = scmp.lt.s32.totalorder %s1670_s26, 7  ;;  %s2493_s30 = smov (%p37_p10, %s2491_s30), 0 }
  0x1c   : > { %p1770_p0 = por %p132_p11, %p131_p9  ;;  %s112_s7 = ssub.s32 %s1666_s25, %s2493_s30 }
  0x1d   : > { %p172_p1 = pnand %p1284_p12, %p171_p13  ;;  %s115_s8 = sadd.s32 1, %s1650_s0 }
  0x1e   : > { %p113_p2 = scmp.eq.s32.totalorder %s112_s7, 0  ;;  %s197_s10 = sand.u32 (!%p172_p1), 1, %s1646_s21  }
  0x1f   : > { %175 = sbr.rel (%p172_p1) target bundleno = 622 (0x26e), region = 32  ;;  %s1286_s11 = sshll.u32 (!%p172_p1), %s1658_s23, 4 }
  0x20   : > { %s1778_s9 = scalar_select %p113_p2, %s1650_s0, %s115_s8  }
  0x21   : > { %s1285_s12 = sshll.u32 (!%p172_p1), %s197_s10, 7  ;;  %p201_p3 = scmp.lt.s32.totalorder (!%p172_p1), %s1286_s11, 31 }
  0x22   : > { %s1288_s13 = sshll.u32 (!%p172_p1), %s1654_s22, 4  ;;  %s1795_s7 = scalar_lea.vmem (!%p172_p1), [#allocation5], %s1285_s12 }
  0x23   : > { %p207_p4 = scmp.lt.s32.totalorder (!%p172_p1), %s1288_s13, 47  ;;  %p1290_p5 = scmp.ne.s32.totalorder (!%p172_p1), %s1654_s22, 0 }
  0x24   : > { %s2495_s11 = smov (!%p201_p3, %s1286_s11), 31 }
  0x25   : > { %s1287_s14 = sshll.u32 %s2495_s11, 3  ;;  %s2497_s13 = smov (!%p207_p4, %s1288_s13), 47 }
  0x26   : > { %s1788_s17 = scalar_lea.vmem %s2475_s1, %s1287_s14  ;;  %s1289_s18 = sshll.u32 %s2497_s13, 2 }
  0x27   : > { %s1793_s28 = scalar_lea.vmem %s2476_s2, %s1289_s18  ;;  %217 = sbr.rel (%p1290_p5) target bundleno = 53 (0x35), region = 36 }
  0x2c   : > { %v1673_v0 = vmov 0.0  }
  0x2d   : > { %218 = vst [vmem:[#allocation2 + $0x30] sm:$0xff] %v1673_v0  ;;  %219 = vst [vmem:[#allocation2] sm:$0xff] %v1673_v0 }
  0x2e   : > { %220 = vst [vmem:[#allocation2 + $0x58] sm:$0xff] %v1673_v0  ;;  %221 = vst [vmem:[#allocation2 + $0x18] sm:$0xff] %v1673_v0 }
  0x2f   : > { %222 = vst [vmem:[#allocation2 + $0x50] sm:$0xff] %v1673_v0  ;;  %223 = vst [vmem:[#allocation2 + $0x68] sm:$0xff] %v1673_v0 }
  0x30   : > { %224 = vst [vmem:[#allocation2 + $0x8] sm:$0xff] %v1673_v0  ;;  %225 = vst [vmem:[#allocation2 + $0x48] sm:$0xff] %v1673_v0 }
  0x31   : > { %226 = vst [vmem:[#allocation2 + $0x40] sm:$0xff] %v1673_v0  ;;  %227 = vst [vmem:[#allocation2 + $0x20] sm:$0xff] %v1673_v0 }
  0x32   : > { %228 = vst [vmem:[#allocation2 + $0x10] sm:$0xff] %v1673_v0  ;;  %229 = vst [vmem:[#allocation2 + $0x38] sm:$0xff] %v1673_v0 }
  0x33   : > { %230 = vst [vmem:[#allocation2 + $0x60] sm:$0xff] %v1673_v0  ;;  %231 = vst [vmem:[#allocation2 + $0x70] sm:$0xff] %v1673_v0 }
  0x34   : > { %232 = vst [vmem:[#allocation2 + $0x78] sm:$0xff] %v1673_v0  ;;  %233 = vst [vmem:[#allocation2 + $0x28] sm:$0xff] %v1673_v0 }
  0x35 PF: > { %s255_s8 = sld [smem:[#allocation4]]  ;;  %v1674_v1 = vmov 0   ;;  %v1801_v2 = vld [vmem:[%s1788_s17 + $0x10] sm:$0xff]  ;;  %v1804_v3 = vld [vmem:[%s1788_s17] sm:$0xff]  ;;  %v1807_v4 = vld [vmem:[%s1788_s17 + $0x18] sm:$0xff]  ;;  %v1675_v36 = vmov 1  }
  0x36   : > { %1538 = vset.pattern.permute.xlu1 %v1674_v1  ;;  %1537 = vset.pattern.permute.xlu0 %v1674_v1  ;;  %v1812_v6 = vld [vmem:[%s1788_s17 + $0x8] sm:$0xff]  ;;  %v1822_v10 = vld [vmem:[%s1788_s17 + $0x20] sm:$0xff]  ;;  %s1308_s11 = sld [smem:[#allocation4 + $0x1]]  ;;  %v1833_v15 = vld [vmem:[%s1788_s17 + $0x38] sm:$0xff]  ;;  %v1676_v61 = vmov 2   ;;  %s1291_s15 = sshll.u32 %s1654_s22, 7 }
  0x37   : > { %v1819_v9 = vld [vmem:[%s1788_s17 + $0x28] sm:$0xff]  ;;  %v1836_v16 = vld [vmem:[%s1788_s17 + $0x30] sm:$0xff]  ;;  %s1325_s12 = sld [smem:[#allocation4 + $0x2]]  ;;  %v1846_v20 = vld [vmem:[%s1788_s17 + $0x40] sm:$0xff]  ;;  %p1384_p6 = scmp.ne.s32.totalorder %s1654_s22, 2 }
  0x38   : > { %v1843_v19 = vld [vmem:[%s1788_s17 + $0x48] sm:$0xff]  ;;  %v1855_v24 = vld [vmem:[%s1788_s17 + $0x60] sm:$0xff]  ;;  %v1862_v26 = vld [vmem:[%s1788_s17 + $0x58] sm:$0xff]  ;;  %s1342_s13 = sld [smem:[#allocation4 + $0x3]] }
  0x39   : > { %v1869_v28 = vld [vmem:[%s1788_s17 + $0x70] sm:$0xff]  ;;  %v1937_v52 = vld [vmem:[%s1788_s17 + $0x68] sm:$0xff]  ;;  %s1359_s14 = sld [smem:[#allocation4 + $0x4]]  ;;  %v1956_v59 = vld [vmem:[%s1788_s17 + $0x78] sm:$0xff] }
  0x3a   : > { %v1903_v40 = vld [vmem:[%s1788_s17 + $0x50] sm:$0xff] }
  0x3b   : > { %v1809_v5 = vstv %s255_s8 }
  0x3c   : > { %v259_v7 = vadd.s32 %v1809_v5, %v1801_v2  ;;  %v257_v8 = vadd.s32 %v1809_v5, %v1804_v3  ;;  %v260_v11 = vadd.s32 %v1809_v5, %v1807_v4  ;;  %v258_v12 = vadd.s32 %v1809_v5, %v1812_v6 }
  0x3d   : > { %v262_v13 = vadd.s32 %v1809_v5, %v1819_v9  ;;  %v261_v14 = vadd.s32 %v1809_v5, %v1822_v10  ;;  %v264_v17 = vadd.s32 %v1809_v5, %v1833_v15  ;;  %v263_v18 = vadd.s32 %v1809_v5, %v1836_v16 }
  0x3e   : > { %280 = vperm.xlu1 %1538, %v259_v7   ;;  %274 = vperm.xlu0 %1537, %v257_v8   ;;  %v1848_v21 = vstv %s1308_s11  ;;  %v266_v22 = vadd.s32 %v1809_v5, %v1843_v19  ;;  %v265_v23 = vadd.s32 %v1809_v5, %v1846_v20  ;;  %v1871_v29 = vstv %s1325_s12 }
  0x3f   : > { %v1859_v25 = vadd.s32 %v1848_v21, %v1822_v10  ;;  %v1866_v27 = vadd.s32 %v1848_v21, %v1855_v24  ;;  %v1875_v30 = vadd.s32 %v1848_v21, %v1836_v16  ;;  %v1879_v31 = vadd.s32 %v1848_v21, %v1869_v28 }
  0x40   : > { %v1883_v32 = vadd.s32 %v1871_v29, %v1819_v9  ;;  %v268_v33 = vadd.s32 %v1809_v5, %v1862_v26  ;;  %v388_v34 = vadd.s32 %v1848_v21, %v1812_v6  ;;  %v1891_v35 = vadd.s32 %v1871_v29, %v1855_v24 }
  0x41   : > { %v269_v37 = vadd.s32 %v1809_v5, %v1855_v24  ;;  %v395_v38 = vadd.s32 %v1848_v21, %v1846_v20  ;;  %v1900_v39 = vadd.s32 %v1871_v29, %v1836_v16  ;;  %v271_v41 = vadd.s32 %v1809_v5, %v1869_v28 }
  0x42   : > { %283 = vperm.xlu1 %1538, %v260_v11   ;;  %277 = vperm.xlu0 %1537, %v258_v12   ;;  %v1909_v42 = vadd.s32 %v1871_v29, %v1869_v28  ;;  %v267_v43 = vadd.s32 %v1809_v5, %v1903_v40  ;;  %v387_v44 = vadd.s32 %v1848_v21, %v1804_v3  ;;  %v1916_v45 = vstv %s1342_s13 }
  0x43   : > { %v1920_v46 = vadd.s32 %v1916_v45, %v1822_v10  ;;  %v389_v47 = vadd.s32 %v1848_v21, %v1801_v2  ;;  %v396_v48 = vadd.s32 %v1848_v21, %v1843_v19  ;;  %v1930_v49 = vadd.s32 %v1916_v45, %v1855_v24 }
  0x44   : > { %v390_v50 = vadd.s32 %v1848_v21, %v1807_v4  ;;  %v397_v51 = vadd.s32 %v1848_v21, %v1903_v40  ;;  %v1941_v53 = vadd.s32 %v1916_v45, %v1937_v52  ;;  %v398_v54 = vadd.s32 %v1848_v21, %v1862_v26 }
  0x45   : > { %v392_v55 = vadd.s32 %v1848_v21, %v1819_v9  ;;  %v1949_v56 = vadd.s32 %v1916_v45, %v1833_v15  ;;  %v517_v57 = vadd.s32 %v1871_v29, %v1804_v3  ;;  %v394_v58 = vadd.s32 %v1848_v21, %v1833_v15 }
  0x46   : > { %289 = vperm.xlu1 %1538, %v262_v13   ;;  %286 = vperm.xlu0 %1537, %v261_v14   ;;  %v1960_v60 = vadd.s32 %v1916_v45, %v1956_v59  ;;  %v525_v62 = vadd.s32 %v1871_v29, %v1846_v20  ;;  %v518_v63 = vadd.s32 %v1871_v29, %v1812_v6  ;;  %v1967_v0 = vstv %s1359_s14 }
  0x47   : > { %v1971_v7 = vadd.s32 %v1967_v0, %v1819_v9  ;;  %v526_v8 = vadd.s32 %v1871_v29, %v1843_v19  ;;  %v519_v11 = vadd.s32 %v1871_v29, %v1801_v2  ;;  %v1980_v12 = vadd.s32 %v1967_v0, %v1855_v24 }
  0x48   : > { %v520_v13 = vadd.s32 %v1871_v29, %v1807_v4  ;;  %v527_v14 = vadd.s32 %v1871_v29, %v1903_v40  ;;  %v648_v24 = vadd.s32 %v1916_v45, %v1812_v6 }
  0x4a   : > { %295 = vperm.xlu1 %1538, %v264_v17   ;;  %292 = vperm.xlu0 %1537, %v263_v18   ;;  %v1988_v17 = vadd.s32 %v1967_v0, %v1836_v16  ;;  %v528_v18 = vadd.s32 %v1871_v29, %v1862_v26 }
  0x4e   : > { %301 = vperm.xlu1 %1538, %v266_v22   ;;  %298 = vperm.xlu0 %1537, %v265_v23   ;;  %v521_v22 = vadd.s32 %v1871_v29, %v1822_v10  ;;  %v1996_v23 = vadd.s32 %v1967_v0, %v1869_v28 }
  0x52   : > { %1539 = vset.pattern.permute.xlu1 %v1675_v36  ;;  %307 = vperm.xlu0 %1537, %v268_v33   ;;  %v530_v33 = vadd.s32 %v1871_v29, %v1937_v52 }
  0x53   : > { %407 = vperm.xlu1 %1539, %v388_v34   ;;  %v1677_v34 = vmov 3  }
  0x56   : > { %310 = vperm.xlu0 %1537, %v269_v37   ;;  %v655_v37 = vadd.s32 %v1916_v45, %v1846_v20 }
  0x57   : > { %428 = vperm.xlu1 %1539, %v395_v38   ;;  %v524_v38 = vadd.s32 %v1871_v29, %v1833_v15 }
  0x5a   : > { %316 = vperm.xlu0 %1537, %v271_v41   ;;  %v649_v41 = vadd.s32 %v1916_v45, %v1801_v2 }
  0x5b   : > { %1540 = vset.pattern.permute.xlu1 %v1674_v1 }
  0x5c   : > { %304 = vperm.xlu1 %1540, %v267_v43   ;;  %v532_v43 = vadd.s32 %v1871_v29, %v1956_v59  ;;  %v1556_v29 = vld [vmem:[%s1793_s28 + $0x38] sm:$0xff]  }
  0x5d   : > { %1408 = vmatprep.subr.bf16.mxu0 %v1556_v29  ;;  %1440 = vmatprep.subr.bf16.mxu1 %v1556_v29 }
  0x5e   : > { %1547 = vset.pattern.permute.xlu0 %v1675_v36  ;;  %1409 = vmatpush3.bf16.msra.mxu0 %v1556_v29 }
  0x5f   : > { %404 = vperm.xlu0 %1547, %v387_v44   ;;  %v657_v44 = vadd.s32 %v1916_v45, %v1903_v40  ;;  %1448 = vmatpush3.bf16.msra.mxu1 %v1556_v29 }
  0x60   : > { %1541 = vset.pattern.permute.xlu1 %v1675_v36 }
  0x61   : > { %410 = vperm.xlu1 %1541, %v389_v47   ;;  %v647_v47 = vadd.s32 %v1916_v45, %v1804_v3 }
  0x63   : > { %431 = vperm.xlu0 %1547, %v396_v48   ;;  %v777_v48 = vadd.s32 %v1967_v0, %v1804_v3  ;;  %v1557_v3 = vld [vmem:[%s1793_s28 + $0x30] sm:$0xff]  }
  0x64   : > { %1410 = vmatprep.subr.bf16.mxu0 %v1557_v3  ;;  %1441 = vmatprep.subr.bf16.mxu1 %v1557_v3 }
  0x65   : > { %413 = vperm.xlu1 %1541, %v390_v50   ;;  %v656_v50 = vadd.s32 %v1916_v45, %v1843_v19  ;;  %1411 = vmatpush3.bf16.msra.mxu0 %v1557_v3 }
  0x66   : > { %1449 = vmatpush3.bf16.msra.mxu1 %v1557_v3 }
  0x67   : > { %434 = vperm.xlu0 %1547, %v397_v51   ;;  %v1678_v51 = vmov 4  }
  0x69   : > { %437 = vperm.xlu1 %1541, %v398_v54   ;;  %v785_v54 = vadd.s32 %v1967_v0, %v1846_v20  ;;  %v1558_v20 = vld [vmem:[%s1793_s28 + $0x28] sm:$0xff]  }
  0x6a   : > { %1412 = vmatprep.subr.bf16.mxu0 %v1558_v20  ;;  %1442 = vmatprep.subr.bf16.mxu1 %v1558_v20 }
  0x6b   : > { %419 = vperm.xlu0 %1547, %v392_v55   ;;  %v650_v55 = vadd.s32 %v1916_v45, %v1807_v4  ;;  %1413 = vmatpush3.bf16.msra.mxu0 %v1558_v20 }
  0x6c   : > { %1450 = vmatpush3.bf16.msra.mxu1 %v1558_v20 }
  0x6d   : > { %1542 = vset.pattern.permute.xlu1 %v1676_v61 }
  0x6e   : > { %534 = vperm.xlu1 %1542, %v517_v57   ;;  %v786_v57 = vadd.s32 %v1967_v0, %v1843_v19  ;;  %v1559_v19 = vld [vmem:[%s1793_s28 + $0x20] sm:$0xff]  }
  0x6f   : > { %425 = vperm.xlu0 %1547, %v394_v58   ;;  %v658_v58 = vadd.s32 %v1916_v45, %v1862_v26  ;;  %1414 = vmatprep.subr.bf16.mxu0 %v1559_v19 }
  0x70   : > { %1415 = vmatpush3.bf16.msra.mxu0 %v1559_v19  ;;  %1443 = vmatprep.subr.bf16.mxu1 %v1559_v19 }
  0x71   : > { %1451 = vmatpush3.bf16.msra.mxu1 %v1559_v19 }
  0x72   : > { %558 = vperm.xlu1 %1542, %v525_v62   ;;  %v780_v62 = vadd.s32 %v1967_v0, %v1807_v4  ;;  %v1560_v4 = vld [vmem:[%s1793_s28 + $0x18] sm:$0xff]  }
  0x73   : > { %1550 = vset.pattern.permute.xlu0 %v1676_v61  ;;  %1416 = vmatprep.subr.bf16.mxu0 %v1560_v4 }
  0x74   : > { %537 = vperm.xlu0 %1550, %v518_v63   ;;  %v652_v63 = vadd.s32 %v1916_v45, %v1819_v9  ;;  %v270_v9 = vadd.s32 %v1809_v5, %v1937_v52  ;;  %1417 = vmatpush3.bf16.msra.mxu0 %v1560_v4 }
  0x75   : > { %1444 = vmatprep.subr.bf16.mxu1 %v1560_v4 }
  0x76   : > { %561 = vperm.xlu1 %1542, %v526_v8   ;;  %v788_v8 = vadd.s32 %v1967_v0, %v1862_v26  ;;  %v1561_v26 = vld [vmem:[%s1793_s28 + $0x10] sm:$0xff]   ;;  %1452 = vmatpush3.bf16.msra.mxu1 %v1560_v4 }
  0x77   : > { %1418 = vmatprep.subr.bf16.mxu0 %v1561_v26  ;;  %1445 = vmatprep.subr.bf16.mxu1 %v1561_v26 }
  0x78   : > { %540 = vperm.xlu0 %1550, %v519_v11   ;;  %v653_v11 = vadd.s32 %v1916_v45, %v1836_v16  ;;  %v778_v16 = vadd.s32 %v1967_v0, %v1812_v6  ;;  %1419 = vmatpush3.bf16.msra.mxu0 %v1561_v26  ;;  %v400_v6 = vadd.s32 %v1848_v21, %v1937_v52 }
  0x7a   : > { %543 = vperm.xlu1 %1542, %v520_v13   ;;  %v661_v13 = vadd.s32 %v1916_v45, %v1869_v28  ;;  %1453 = vmatpush3.bf16.msra.mxu1 %v1561_v26  ;;  %v779_v28 = vadd.s32 %v1967_v0, %v1801_v2  ;;  %v1563_v45 = vld [vmem:[%s1793_s28] sm:$0xff]   ;;  %v781_v2 = vadd.s32 %v1967_v0, %v1822_v10 }
  0x7c   : > { %564 = vperm.xlu0 %1550, %v527_v14   ;;  %v1562_v14 = vld [vmem:[%s1793_s28 + $0x8] sm:$0xff]  }
  0x7d   : > { %1420 = vmatprep.subr.bf16.mxu0 %v1562_v14  ;;  %1446 = vmatprep.subr.bf16.mxu1 %v1562_v14 }
  0x7e   : > { %567 = vperm.xlu1 %1542, %v528_v18   ;;  %1421 = vmatpush3.bf16.msra.mxu0 %v1562_v14  ;;  %v787_v18 = vadd.s32 %v1967_v0, %v1903_v40 }
  0x7f   : > { %1454 = vmatpush3.bf16.msra.mxu1 %v1562_v14  ;;  %1422 = vmatprep.subr.bf16.mxu0 %v1563_v45 }
  0x80   : > { %546 = vperm.xlu0 %1550, %v521_v22   ;;  %1447 = vmatprep.subr.bf16.mxu1 %v1563_v45 }
  0x82   : > { %1543 = vset.pattern.permute.xlu1 %v1677_v34  ;;  %1423 = vmatpush3.bf16.msra.mxu0 %v1563_v45 }
  0x83   : > { %667 = vperm.xlu1 %1543, %v648_v24   ;;  %1455 = vmatpush3.bf16.msra.mxu1 %v1563_v45 }
  0x84   : > { %573 = vperm.xlu0 %1550, %v530_v33  }
  0x87   : > { %688 = vperm.xlu1 %1543, %v655_v37   ;;  %v784_v37 = vadd.s32 %v1967_v0, %v1833_v15 }
  0x88   : > { %555 = vperm.xlu0 %1550, %v524_v38  }
  0x8b   : > { %670 = vperm.xlu1 %1543, %v649_v41  }
  0x8c   : > { %579 = vperm.xlu0 %1550, %v532_v43  }
  0x8f   : > { %694 = vperm.xlu1 %1543, %v657_v44  }
  0x90   : > { %1552 = vset.pattern.permute.xlu0 %v1677_v34 }
  0x91   : > { %664 = vperm.xlu0 %1552, %v647_v47  }
  0x93   : > { %1544 = vset.pattern.permute.xlu1 %v1678_v51 }
  0x94   : > { %794 = vperm.xlu1 %1544, %v777_v48  }
  0x95   : > { %691 = vperm.xlu0 %1552, %v656_v50  }
  0x98   : > { %818 = vperm.xlu1 %1544, %v785_v54  }
  0x99   : > { %673 = vperm.xlu0 %1552, %v650_v55  }
  0x9c   : > { %821 = vperm.xlu1 %1544, %v786_v57  }
  0x9d   : > { %697 = vperm.xlu0 %1552, %v658_v58  }
  0xa0   : > { %803 = vperm.xlu1 %1544, %v780_v62  }
  0xa1   : > { %679 = vperm.xlu0 %1552, %v652_v63  }
  0xa4   : > { %827 = vperm.xlu1 %1544, %v788_v8  }
  0xa5   : > { %682 = vperm.xlu0 %1552, %v653_v11  }
  0xa8   : > { %1545 = vset.pattern.permute.xlu1 %v1674_v1 }
  0xa9   : > { %313 = vperm.xlu1 %1545, %v270_v9   ;;  %706 = vperm.xlu0 %1552, %v661_v13  }
  0xad   : > { %1546 = vset.pattern.permute.xlu1 %v1675_v36  ;;  %1554 = vset.pattern.permute.xlu0 %v1678_v51 }
  0xae   : > { %416 = vperm.xlu1 %1546, %v1859_v25   ;;  %797 = vperm.xlu0 %1554, %v778_v16   ;;  %v272_v25 = vadd.s32 %v1809_v5, %v1956_v59  ;;  %v235_v5 = vlaneseq }
  0xb0   : > { %v236_v15 = vand.u32 127, %v235_v5 }
  0xb2   : > { %440 = vperm.xlu1 %1546, %v1866_v27   ;;  %800 = vperm.xlu0 %1554, %v779_v28   ;;  %v790_v27 = vadd.s32 %v1967_v0, %v1937_v52  ;;  %v402_v52 = vadd.s32 %v1848_v21, %v1956_v59 }
  0xb6   : > { %443 = vperm.xlu1 %1546, %v400_v6   ;;  %824 = vperm.xlu0 %1554, %v787_v18  }
  0xb9   : > { %v281_v22 = vpop.permute.xlu1 %280  ;;  %v275_v24 = vpop.permute.xlu0 %274 }
  0xba   : > { %1548 = vset.pattern.permute.xlu1 %v1674_v1  ;;  %806 = vperm.xlu0 %1554, %v781_v2   ;;  %v792_v1 = vadd.s32 %v1967_v0, %v1956_v59 }
  0xbb   : > { %319 = vperm.xlu1 %1548, %v272_v25  }
  0xbd   : > { %v284_v40 = vpop.permute.xlu1 %283  ;;  %v278_v33 = vpop.permute.xlu0 %277 }
  0xbe   : > { %833 = vperm.xlu0 %1554, %v790_v27  }
  0xbf   : > { %1549 = vset.pattern.permute.xlu1 %v1675_v36 }
  0xc0   : > { %422 = vperm.xlu1 %1549, %v1875_v30   ;;  %v237_v30 = vstv %s1291_s15 }
  0xc1   : > { %v2073_v10 = vpop.permute.xlu1 %289  ;;  %v2075_v38 = vpop.permute.xlu0 %286  ;;  %v2087_v43 = vadd.s32 %v237_v30, %v236_v15 }
  0xc2   : > { %815 = vperm.xlu0 %1554, %v784_v37  }
  0xc3   : > { %vm322_vm0 = vcmp.eq.s32.totalorder %v278_v33, %v2087_v43  ;;  %vm321_vm2 = vcmp.eq.s32.totalorder %v275_v24, %v2087_v43  ;;  %vm323_vm3 = vcmp.eq.s32.totalorder %v281_v22, %v2087_v43  ;;  %vm324_vm6 = vcmp.eq.s32.totalorder %v284_v40, %v2087_v43 }
  0xc4   : > { %446 = vperm.xlu1 %1549, %v1879_v31   ;;  %v1679_v31 = vmov 0.0   ;;  %vm326_vm11 = vcmp.eq.s32.totalorder %v2073_v10, %v2087_v43 }
  0xc5   : > { %v2083_v41 = vpop.permute.xlu1 %295  ;;  %v2085_v36 = vpop.permute.xlu0 %292  ;;  %v1293_v59 = vsel %vm322_vm0, 1.0, %v1679_v31  ;;  %v1292_v55 = vsel %vm321_vm2, 1.0, %v1679_v31  ;;  %v1297_v28 = vsel %vm326_vm11, 1.0, %v1679_v31 }
  0xc6   : > { %839 = vperm.xlu0 %1554, %v792_v1   ;;  %vm328_vm14 = vcmp.eq.s32.totalorder %v2083_v41, %v2087_v43 }
  0xc8   : > { %449 = vperm.xlu1 %1549, %v402_v52  }
  0xc9   : > { %v2089_v44 = vpop.permute.xlu1 %301  ;;  %v2091_v47 = vpop.permute.xlu0 %298 }
  0xcc   : > { %1551 = vset.pattern.permute.xlu1 %v1676_v61 }
  0xcd   : > { %549 = vperm.xlu1 %1551, %v1883_v32   ;;  %v308_v21 = vpop.permute.xlu0 %307 }
  0xce   : > { %v408_v0 = vpop.permute.xlu1 %407  ;;  %vm332_vm7 = vcmp.eq.s32.totalorder %v308_v21, %v2087_v43 }
  0xcf   : > { %vm452_vm1 = vcmp.eq.s32.totalorder %v408_v0, %v2087_v43  ;;  %v1303_v11 = vsel %vm332_vm7, 1.0, %v1679_v31 }
  0xd0   : > { %v1310_v48 = vsel %vm452_vm1, 1.0, %v1679_v31  ;;  %vm329_vm1 = vcmp.eq.s32.totalorder %v2091_v47, %v2087_v43 }
  0xd1   : > { %v2099_v50 = vadd.f32 %v1310_v48, %v1293_v59  ;;  %570 = vperm.xlu1 %1551, %v1891_v35   ;;  %v2102_v29 = vpop.permute.xlu0 %310  ;;  %v1300_v59 = vsel %vm329_vm1, 1.0, %v1679_v31 }
  0xd2   : > { %v2104_v54 = vpop.permute.xlu1 %428 }
  0xd3   : > { %vm459_vm2 = vcmp.eq.s32.totalorder %v2104_v54, %v2087_v43 }
  0xd4   : > { %v1317_v47 = vsel %vm459_vm2, 1.0, %v1679_v31 }
  0xd5   : > { %552 = vperm.xlu1 %1551, %v1900_v39   ;;  %v2107_v32 = vpop.permute.xlu0 %316  ;;  %v1294_v39 = vsel %vm323_vm3, 1.0, %v1679_v31 }
  0xd7   : > { %v305_v61 = vpop.permute.xlu1 %304 }
  0xd8   : > { %vm331_vm8 = vcmp.eq.s32.totalorder %v305_v61, %v2087_v43 }
  0xd9   : > { %576 = vperm.xlu1 %1551, %v1909_v42   ;;  %v1302_v4 = vsel %vm331_vm8, 1.0, %v1679_v31 }
  0xda   : > { %v405_v3 = vpop.permute.xlu0 %404 }
  0xdb   : > { %vm451_vm4 = vcmp.eq.s32.totalorder %v405_v3, %v2087_v43 }
  0xdc   : > { %v1309_v35 = vsel %vm451_vm4, 1.0, %v1679_v31  ;;  %v411_v57 = vpop.permute.xlu1 %410  ;;  %vm330_vm4 = vcmp.eq.s32.totalorder %v2089_v44, %v2087_v43 }
  0xdd   : > { %v2115_v58 = vadd.f32 %v1309_v35, %v1292_v55  ;;  %vm453_vm5 = vcmp.eq.s32.totalorder %v411_v57, %v2087_v43  ;;  %1553 = vset.pattern.permute.xlu1 %v1677_v34  ;;  %v1295_v34 = vsel %vm324_vm6, 1.0, %v1679_v31  ;;  %v1301_v48 = vsel %vm330_vm4, 1.0, %v1679_v31 }
  0xde   : > { %v1311_v42 = vsel %vm453_vm5, 1.0, %v1679_v31  ;;  %676 = vperm.xlu1 %1553, %v1920_v46   ;;  %v2122_v20 = vpop.permute.xlu0 %431  ;;  %v507_v55 = vadd.f32 %v1317_v47, %v1300_v59 }
  0xdf   : > { %v2125_v62 = vadd.f32 %v1311_v42, %v1294_v39  ;;  %vm460_vm3 = vcmp.eq.s32.totalorder %v2122_v20, %v2087_v43 }
  0xe0   : > { %v414_v63 = vpop.permute.xlu1 %413  ;;  %v1318_v0 = vsel %vm460_vm3, 1.0, %v1679_v31 }
  0xe1   : > { %vm454_vm9 = vcmp.eq.s32.totalorder %v414_v63, %v2087_v43  ;;  %v508_v3 = vadd.f32 %v1318_v0, %v1301_v48 }
  0xe2   : > { %v1312_v19 = vsel %vm454_vm9, 1.0, %v1679_v31  ;;  %700 = vperm.xlu1 %1553, %v1930_v49   ;;  %v435_v46 = vpop.permute.xlu0 %434 }
  0xe3   : > { %v2133_v8 = vadd.f32 %v1312_v19, %v1295_v34  ;;  %vm461_vm10 = vcmp.eq.s32.totalorder %v435_v46, %v2087_v43 }
  0xe4   : > { %v1319_v9 = vsel %vm461_vm10, 1.0, %v1679_v31  ;;  %v438_v13 = vpop.permute.xlu1 %437 }
  0xe5   : > { %v2141_v26 = vadd.f32 %v1319_v9, %v1302_v4  ;;  %vm462_vm12 = vcmp.eq.s32.totalorder %v438_v13, %v2087_v43 }
  0xe6   : > { %v1320_v49 = vsel %vm462_vm12, 1.0, %v1679_v31  ;;  %703 = vperm.xlu1 %1553, %v1941_v53   ;;  %v420_v16 = vpop.permute.xlu0 %419  ;;  %v1299_v53 = vsel %vm328_vm14, 1.0, %v1679_v31 }
  0xe7   : > { %v2146_v14 = vadd.f32 %v1320_v49, %v1303_v11  ;;  %vm456_vm13 = vcmp.eq.s32.totalorder %v420_v16, %v2087_v43 }
  0xe8   : > { %v1314_v45 = vsel %vm456_vm13, 1.0, %v1679_v31 }
  0xe9   : > { %v2153_v6 = vadd.f32 %v1314_v45, %v1297_v28  ;;  %v2155_v18 = vpop.permute.xlu1 %534 }
  0xea   : > { %685 = vperm.xlu1 %1553, %v1949_v56   ;;  %v426_v2 = vpop.permute.xlu0 %425  ;;  %vm581_vm11 = vcmp.eq.s32.totalorder %v2155_v18, %v2087_v43 }
  0xeb   : > { %vm458_vm15 = vcmp.eq.s32.totalorder %v426_v2, %v2087_v43 }
  0xec   : > { %v1316_v25 = vsel %vm458_vm15, 1.0, %v1679_v31  ;;  %vm325_vm15 = vcmp.eq.s32.totalorder %v2075_v38, %v2087_v43 }
  0xed   : > { %v506_v22 = vadd.f32 %v1316_v25, %v1299_v53  ;;  %v559_v24 = vpop.permute.xlu1 %558  ;;  %v1326_v53 = vsel %vm581_vm11, 1.0, %v1679_v31 }
  0xee   : > { %709 = vperm.xlu1 %1553, %v1960_v60   ;;  %vm589_vm5 = vcmp.eq.s32.totalorder %v559_v24, %v2087_v43 }
  0xef   : > { %v2162_v27 = vpop.permute.xlu0 %537  ;;  %v1334_v54 = vsel %vm589_vm5, 1.0, %v1679_v31 }
  0xf0   : > { %v637_v42 = vadd.f32 %v1334_v54, %v507_v55  ;;  %vm582_vm12 = vcmp.eq.s32.totalorder %v2162_v27, %v2087_v43 }
  0xf1   : > { %v562_v40 = vpop.permute.xlu1 %561  ;;  %v1327_v18 = vsel %vm582_vm12, 1.0, %v1679_v31 }
  0xf2   : > { %1555 = vset.pattern.permute.xlu1 %v1678_v51  ;;  %vm590_vm6 = vcmp.eq.s32.totalorder %v562_v40, %v2087_v43  ;;  %v1296_v40 = vsel %vm325_vm15, 1.0, %v1679_v31 }
  0xf3   : > { %809 = vperm.xlu1 %1555, %v1971_v7   ;;  %v2166_v33 = vpop.permute.xlu0 %540  ;;  %v1335_v44 = vsel %vm590_vm6, 1.0, %v1679_v31 }
  0xf4   : > { %v638_v20 = vadd.f32 %v1335_v44, %v508_v3  ;;  %vm583_vm13 = vcmp.eq.s32.totalorder %v2166_v33, %v2087_v43  ;;  %v629_v33 = vadd.f32 %v1326_v53, %v2115_v58 }
  0xf5   : > { %v2168_v56 = vpop.permute.xlu1 %543  ;;  %v1328_v25 = vsel %vm583_vm13, 1.0, %v1679_v31 }
  0xf6   : > { %vm584_vm14 = vcmp.eq.s32.totalorder %v2168_v56, %v2087_v43 }
  0xf7   : > { %830 = vperm.xlu1 %1555, %v1980_v12   ;;  %v2171_v37 = vpop.permute.xlu0 %564 }
  0xf8   : > { %vm591_vm2 = vcmp.eq.s32.totalorder %v2171_v37, %v2087_v43 }
  0xf9   : > { %v2173_v5 = vpop.permute.xlu1 %567  ;;  %v1336_v37 = vsel %vm591_vm2, 1.0, %v1679_v31 }
  0xfa   : > { %vm592_vm6 = vcmp.eq.s32.totalorder %v2173_v5, %v2087_v43 }
  0xfb   : > { %812 = vperm.xlu1 %1555, %v1988_v17   ;;  %v2176_v60 = vpop.permute.xlu0 %546  ;;  %v1337_v5 = vsel %vm592_vm6, 1.0, %v1679_v31  ;;  %vm327_vm6 = vcmp.eq.s32.totalorder %v2085_v36, %v2087_v43 }
  0xfe   : > { %v2178_v10 = vpop.permute.xlu1 %667 }
  0xff   : > { %836 = vperm.xlu1 %1555, %v1996_v23   ;;  %v2181_v51 = vpop.permute.xlu0 %573  ;;  %vm712_vm1 = vcmp.eq.s32.totalorder %v2178_v10, %v2087_v43  ;;  %v630_v10 = vadd.f32 %v1327_v18, %v2099_v50 }
 0x100   : > { %v1344_v56 = vsel %vm712_vm1, 1.0, %v1679_v31 }
 0x102   : > { %v689_v7 = vpop.permute.xlu1 %688 }
 0x103   : > { %v556_v1 = vpop.permute.xlu0 %555  ;;  %vm719_vm7 = vcmp.eq.s32.totalorder %v689_v7, %v2087_v43  ;;  %v631_v7 = vadd.f32 %v1328_v25, %v2125_v62 }
 0x104   : > { %vm588_vm0 = vcmp.eq.s32.totalorder %v556_v1, %v2087_v43  ;;  %v1351_v57 = vsel %vm719_vm7, 1.0, %v1679_v31  ;;  %vm585_vm7 = vcmp.eq.s32.totalorder %v2176_v60, %v2087_v43 }
 0x105   : > { %v1333_v12 = vsel %vm588_vm0, 1.0, %v1679_v31  ;;  %v767_v19 = vadd.f32 %v1351_v57, %v637_v42  ;;  %v1330_v60 = vsel %vm585_vm7, 1.0, %v1679_v31 }
 0x106   : > { %v2185_v52 = vadd.f32 %v1333_v12, %v506_v22  ;;  %v2187_v15 = vpop.permute.xlu1 %670  ;;  %v1329_v22 = vsel %vm584_vm14, 1.0, %v1679_v31  ;;  %v760_v12 = vadd.f32 %v1344_v56, %v630_v10 }
 0x107   : > { %v2189_v41 = vpop.permute.xlu0 %579  ;;  %vm713_vm3 = vcmp.eq.s32.totalorder %v2187_v15, %v2087_v43  ;;  %v632_v1 = vadd.f32 %v1329_v22, %v2133_v8 }
 0x108   : > { %v1345_v15 = vsel %vm713_vm3, 1.0, %v1679_v31 }
 0x109   : > { %v761_v48 = vadd.f32 %v1345_v15, %v631_v7 }
 0x10a   : > { %v2191_v17 = vpop.permute.xlu1 %694 }
 0x10c   : > { %v665_v30 = vpop.permute.xlu0 %664 }
 0x10d   : > { %vm711_vm0 = vcmp.eq.s32.totalorder %v665_v30, %v2087_v43 }
 0x10e   : > { %v1343_v38 = vsel %vm711_vm0, 1.0, %v1679_v31  ;;  %vm594_vm0 = vcmp.eq.s32.totalorder %v2181_v51, %v2087_v43 }
 0x10f   : > { %v2199_v23 = vpop.permute.xlu1 %794  ;;  %v759_v58 = vadd.f32 %v1343_v38, %v629_v33  ;;  %v1339_v18 = vsel %vm594_vm0, 1.0, %v1679_v31 }
 0x110   : > { %v692_v21 = vpop.permute.xlu0 %691  ;;  %vm841_vm4 = vcmp.eq.s32.totalorder %v2199_v23, %v2087_v43 }
 0x111   : > { %vm720_vm8 = vcmp.eq.s32.totalorder %v692_v21, %v2087_v43  ;;  %v1360_v50 = vsel %vm841_vm4, 1.0, %v1679_v31 }
 0x112   : > { %v1352_v39 = vsel %vm720_vm8, 1.0, %v1679_v31  ;;  %vm721_vm8 = vcmp.eq.s32.totalorder %v2191_v17, %v2087_v43  ;;  %v889_v47 = vadd.f32 %v1360_v50, %v759_v58 }
 0x113   : > { %v819_v61 = vpop.permute.xlu1 %818  ;;  %v768_v46 = vadd.f32 %v1352_v39, %v638_v20  ;;  %v1353_v54 = vsel %vm721_vm8, 1.0, %v1679_v31  ;;  %v639_v39 = vadd.f32 %v1336_v37, %v2141_v26  ;;  %v640_v20 = vadd.f32 %v1337_v5, %v2146_v14 }
 0x114   : > { %vm849_vm9 = vcmp.eq.s32.totalorder %v819_v61, %v2087_v43  ;;  %v674_v35 = vpop.permute.xlu0 %673  ;;  %vm335_vm8 = vcmp.eq.s32.totalorder %v2107_v32, %v2087_v43 }
 0x115   : > { %v1368_v63 = vsel %vm849_vm9, 1.0, %v1679_v31  ;;  %vm714_vm5 = vcmp.eq.s32.totalorder %v674_v35, %v2087_v43 }
 0x116   : > { %v897_v9 = vadd.f32 %v1368_v63, %v767_v19  ;;  %v1346_v30 = vsel %vm714_vm5, 1.0, %v1679_v31  ;;  %v769_v19 = vadd.f32 %v1353_v54, %v639_v39 }
 0x117   : > { %v822_v34 = vpop.permute.xlu1 %821  ;;  %v762_v44 = vadd.f32 %v1346_v30, %v632_v1 }
 0x118   : > { %vm850_vm10 = vcmp.eq.s32.totalorder %v822_v34, %v2087_v43  ;;  %v2218_v11 = vpop.permute.xlu0 %697 }
 0x119   : > { %v1369_v4 = vsel %vm850_vm10, 1.0, %v1679_v31  ;;  %vm722_vm12 = vcmp.eq.s32.totalorder %v2218_v11, %v2087_v43 }
 0x11a   : > { %v898_v13 = vadd.f32 %v1369_v4, %v768_v46  ;;  %v1354_v42 = vsel %vm722_vm12, 1.0, %v1679_v31 }
 0x11b   : > { %v804_v49 = vpop.permute.xlu1 %803  ;;  %v770_v4 = vadd.f32 %v1354_v42, %v640_v20 }
 0x11c   : > { %v2221_v16 = vpop.permute.xlu0 %679  ;;  %v925_v28 = vpack.c.bf16 %v898_v13, %v897_v9  ;;  %vm844_vm9 = vcmp.eq.s32.totalorder %v804_v49, %v2087_v43 }
 0x11d   : > { %v1363_v61 = vsel %vm844_vm9, 1.0, %v1679_v31  ;;  %vm716_vm3 = vcmp.eq.s32.totalorder %v2221_v16, %v2087_v43  ;;  %v1298_v16 = vsel %vm327_vm6, 1.0, %v1679_v31 }
 0x11e   : > { %1432 = vmatprep.mubr.bf16.mxu1 %v925_v28  ;;  %v892_v63 = vadd.f32 %v1363_v61, %v762_v44  ;;  %v1348_v7 = vsel %vm716_vm3, 1.0, %v1679_v31 }
 0x11f   : > { %v2223_v45 = vpop.permute.xlu1 %827 }
 0x120   : > { %v2227_v2 = vpop.permute.xlu0 %682  ;;  %vm852_vm13 = vcmp.eq.s32.totalorder %v2223_v45, %v2087_v43 }
 0x121   : > { %v1371_v46 = vsel %vm852_vm13, 1.0, %v1679_v31  ;;  %vm717_vm9 = vcmp.eq.s32.totalorder %v2227_v2, %v2087_v43 }
 0x122   : > { %v900_v28 = vadd.f32 %v1371_v46, %v770_v4 }
 0x124   : > { %v2244_v24 = vpop.permute.xlu1 %313  ;;  %v2246_v27 = vpop.permute.xlu0 %706 }
 0x125   : > { %vm334_vm15 = vcmp.eq.s32.totalorder %v2244_v24, %v2087_v43 }
 0x126   : > { %v1305_v9 = vsel %vm334_vm15, 1.0, %v1679_v31  ;;  %vm333_vm15 = vcmp.eq.s32.totalorder %v2102_v29, %v2087_v43 }
 0x129   : > { %v417_v62 = vpop.permute.xlu1 %416  ;;  %v798_v8 = vpop.permute.xlu0 %797 }
 0x12a   : > { %vm455_vm10 = vcmp.eq.s32.totalorder %v417_v62, %v2087_v43  ;;  %vm842_vm11 = vcmp.eq.s32.totalorder %v798_v8, %v2087_v43  ;;  %v1306_v62 = vsel %vm335_vm8, 1.0, %v1679_v31  ;;  %v1349_v8 = vsel %vm717_vm9, 1.0, %v1679_v31 }
 0x12b   : > { %v1313_v23 = vsel %vm455_vm10, 1.0, %v1679_v31  ;;  %v1361_v21 = vsel %vm842_vm11, 1.0, %v1679_v31  ;;  %vm725_vm11 = vcmp.eq.s32.totalorder %v2246_v27, %v2087_v43  ;;  %vm596_vm9 = vcmp.eq.s32.totalorder %v2189_v41, %v2087_v43 }
 0x12c   : > { %v503_v59 = vadd.f32 %v1313_v23, %v1296_v40  ;;  %v890_v0 = vadd.f32 %v1361_v21, %v760_v12  ;;  %v1357_v23 = vsel %vm725_vm11, 1.0, %v1679_v31 }
 0x12d   : > { %v2286_v55 = vpop.permute.xlu1 %440  ;;  %v801_v3 = vpop.permute.xlu0 %800 }
 0x12e   : > { %vm843_vm14 = vcmp.eq.s32.totalorder %v801_v3, %v2087_v43  ;;  %v921_v35 = vpack.c.bf16 %v890_v0, %v889_v47  ;;  %v2291_v57 = vadd.f32 %v1330_v60, %v503_v59 }
 0x12f   : > { %v1362_v17 = vsel %vm843_vm14, 1.0, %v1679_v31  ;;  %vm463_vm14 = vcmp.eq.s32.totalorder %v2286_v55, %v2087_v43 }
 0x130   : > { %v891_v34 = vadd.f32 %v1362_v17, %v761_v48  ;;  %1424 = vmatprep.mubr.bf16.mxu0 %v921_v35  ;;  %v1321_v3 = vsel %vm463_vm14, 1.0, %v1679_v31  ;;  %v1304_v35 = vsel %vm333_vm15, 1.0, %v1679_v31 }
 0x131   : > { %v444_v11 = vpop.permute.xlu1 %443  ;;  %v825_v26 = vpop.permute.xlu0 %824  ;;  %v511_v55 = vadd.f32 %v1321_v3, %v1304_v35  ;;  %v914_v35 = vld [vmem:[#allocation2 + $0x20] sm:$0xff] }
 0x132   : > { %vm464_vm1 = vcmp.eq.s32.totalorder %v444_v11, %v2087_v43  ;;  %vm851_vm2 = vcmp.eq.s32.totalorder %v825_v26, %v2087_v43  ;;  %v922_v14 = vpack.c.bf16 %v892_v63, %v891_v34 }
 0x133   : > { %v1322_v13 = vsel %vm464_vm1, 1.0, %v1679_v31  ;;  %v1370_v49 = vsel %vm851_vm2, 1.0, %v1679_v31 }
 0x134   : > { %v512_v45 = vadd.f32 %v1322_v13, %v1305_v9  ;;  %v899_v53 = vadd.f32 %v1370_v49, %v769_v19  ;;  %1425 = vmatmul.mubr.bf16.vlgmr.msra.gmra.mxu0 %v922_v14 }
 0x135   : > { %v807_v48 = vpop.permute.xlu0 %806 }
 0x136   : > { %v2311_v25 = vpop.permute.xlu1 %319  ;;  %v926_v22 = vpack.c.bf16 %v900_v28, %v899_v53  ;;  %v2313_v24 = vadd.f32 %v1339_v18, %v512_v45  ;;  %vm845_vm1 = vcmp.eq.s32.totalorder %v807_v48, %v2087_v43 }
 0x137   : > { %v1364_v42 = vsel %vm845_vm1, 1.0, %v1679_v31 }
 0x138   : > { %1433 = vmatmul.mubr.bf16.vlgmr.msra.gmra.mxu1 %v926_v22 }
 0x139   : > { %v834_v61 = vpop.permute.xlu0 %833 }
 0x13a   : > { %vm854_vm6 = vcmp.eq.s32.totalorder %v834_v61, %v2087_v43 }
 0x13b   : > { %v423_v40 = vpop.permute.xlu1 %422  ;;  %v1373_v13 = vsel %vm854_vm6, 1.0, %v1679_v31 }
 0x13c   : > { %vm457_vm5 = vcmp.eq.s32.totalorder %v423_v40, %v2087_v43 }
 0x13d   : > { %v1315_v58 = vsel %vm457_vm5, 1.0, %v1679_v31  ;;  %v816_v19 = vpop.permute.xlu0 %815 }
 0x13f   : > { %v447_v38 = vpop.permute.xlu1 %446 }
 0x140   : > { %vm465_vm7 = vcmp.eq.s32.totalorder %v447_v38, %v2087_v43 }
 0x141   : > { %v1323_v15 = vsel %vm465_vm7, 1.0, %v1679_v31  ;;  %v840_v40 = vpop.permute.xlu0 %839 }
 0x142   : > { %v513_v32 = vadd.f32 %v1323_v15, %v1306_v62  ;;  %vm856_vm14 = vcmp.eq.s32.totalorder %v840_v40, %v2087_v43  ;;  %v907_v62 = vld [vmem:[#allocation2 + $0x58] sm:$0xff] }
 0x143   : > { %v450_v33 = vpop.permute.xlu1 %449 }
 0x144   : > { %vm466_vm3 = vcmp.eq.s32.totalorder %v450_v33, %v2087_v43 }
 0x145   : > { %v1324_v63 = vsel %vm466_vm3, 1.0, %v1679_v31 }
 0x148   : > { %v550_v56 = vpop.permute.xlu1 %549 }
 0x149   : > { %vm586_vm4 = vcmp.eq.s32.totalorder %v550_v56, %v2087_v43 }
 0x14a   : > { %v1331_v10 = vsel %vm586_vm4, 1.0, %v1679_v31  ;;  %vm336_vm4 = vcmp.eq.s32.totalorder %v2311_v25, %v2087_v43 }
 0x14b   : > { %v634_v51 = vadd.f32 %v1331_v10, %v2153_v6  ;;  %v505_v6 = vadd.f32 %v1315_v58, %v1298_v16 }
 0x14c   : > { %v571_v1 = vpop.permute.xlu1 %570 }
 0x14d   : > { %v764_v37 = vadd.f32 %v1348_v7, %v634_v51  ;;  %vm593_vm0 = vcmp.eq.s32.totalorder %v571_v1, %v2087_v43 }
 0x14e   : > { %v1338_v39 = vsel %vm593_vm0, 1.0, %v1679_v31 }
 0x14f   : > { %v641_v11 = vadd.f32 %v1338_v39, %v511_v55 }
 0x150   : > { %v553_v12 = vpop.permute.xlu1 %552 }
 0x151   : > { %vm587_vm10 = vcmp.eq.s32.totalorder %v553_v12, %v2087_v43  ;;  %v1375_v12 = vsel %vm856_vm14, 1.0, %v1679_v31 }
 0x152   : > { %v1332_v36 = vsel %vm587_vm10, 1.0, %v1679_v31 }
 0x153   : > { %v635_v50 = vadd.f32 %v1332_v36, %v505_v6 }
 0x154   : > { %v577_v30 = vpop.permute.xlu1 %576 }
 0x155   : > { %vm595_vm12 = vcmp.eq.s32.totalorder %v577_v30, %v2087_v43  ;;  %v2339_v2 = vadd.f32 %v1349_v8, %v635_v50  ;;  %v905_v30 = vld [vmem:[#allocation2 + $0x30] sm:$0xff] }
 0x156   : > { %v1340_v5 = vsel %vm595_vm12, 1.0, %v1679_v31  ;;  %vm848_vm12 = vcmp.eq.s32.totalorder %v816_v19, %v2087_v43  ;;  %v919_v19 = vld [vmem:[#allocation2 + $0x78] sm:$0xff] }
 0x157   : > { %v643_v60 = vadd.f32 %v1340_v5, %v513_v32  ;;  %v1367_v51 = vsel %vm848_vm12, 1.0, %v1679_v31  ;;  %v908_v5 = vld [vmem:[#allocation2 + $0x18] sm:$0xff] }
 0x159   : > { %v677_v21 = vpop.permute.xlu1 %676  ;;  %v2343_v59 = vadd.f32 %v1357_v23, %v643_v60  ;;  %v915_v60 = vld [vmem:[#allocation2 + $0x10] sm:$0xff] }
 0x15a   : > { %vm715_vm13 = vcmp.eq.s32.totalorder %v677_v21, %v2087_v43 }
 0x15b   : > { %v1347_v44 = vsel %vm715_vm13, 1.0, %v1679_v31 }
 0x15c   : > { %v763_v29 = vadd.f32 %v1347_v44, %v2291_v57  ;;  %v1307_v57 = vsel %vm336_vm4, 1.0, %v1679_v31 }
 0x15d   : > { %v701_v47 = vpop.permute.xlu1 %700  ;;  %v514_v9 = vadd.f32 %v1324_v63, %v1307_v57 }
 0x15e   : > { %vm723_vm5 = vcmp.eq.s32.totalorder %v701_v47, %v2087_v43  ;;  %v893_v26 = vadd.f32 %v1364_v42, %v763_v29  ;;  %v906_v47 = vld [vmem:[#allocation2] sm:$0xff]  ;;  %v911_v42 = vld [vmem:[#allocation2 + $0x8] sm:$0xff] }
 0x15f   : > { %v1355_v34 = vsel %vm723_vm5, 1.0, %v1679_v31 }
 0x160   : > { %v771_v45 = vadd.f32 %v1355_v34, %v641_v11  ;;  %v912_v34 = vld [vmem:[#allocation2 + $0x48] sm:$0xff] }
 0x161   : > { %v704_v0 = vpop.permute.xlu1 %703 }
 0x162   : > { %vm724_vm2 = vcmp.eq.s32.totalorder %v704_v0, %v2087_v43  ;;  %v913_v0 = vld [vmem:[#allocation2 + $0x40] sm:$0xff] }
 0x163   : > { %v1356_v17 = vsel %vm724_vm2, 1.0, %v1679_v31 }
 0x164   : > { %v772_v4 = vadd.f32 %v1356_v17, %v2313_v24  ;;  %v1341_v24 = vsel %vm596_vm9, 1.0, %v1679_v31 }
 0x165   : > { %v686_v54 = vpop.permute.xlu1 %685  ;;  %v644_v56 = vadd.f32 %v1341_v24, %v514_v9 }
 0x166   : > { %vm718_vm7 = vcmp.eq.s32.totalorder %v686_v54, %v2087_v43  ;;  %v902_v25 = vadd.f32 %v1373_v13, %v772_v4  ;;  %v910_v4 = vld [vmem:[#allocation2 + $0x68] sm:$0xff] }
 0x167   : > { %v1350_v49 = vsel %vm718_vm7, 1.0, %v1679_v31 }
 0x168   : > { %v766_v22 = vadd.f32 %v1350_v49, %v2185_v52 }
 0x169   : > { %v710_v27 = vpop.permute.xlu1 %709 }
 0x16a   : > { %vm726_vm10 = vcmp.eq.s32.totalorder %v710_v27, %v2087_v43  ;;  %v896_v1 = vadd.f32 %v1367_v51, %v766_v22  ;;  %v916_v27 = vld [vmem:[#allocation2 + $0x38] sm:$0xff]  ;;  %v918_v22 = vld [vmem:[#allocation2 + $0x70] sm:$0xff] }
 0x16b   : > { %v1358_v38 = vsel %vm726_vm10, 1.0, %v1679_v31 }
 0x16c   : > { %v774_v52 = vadd.f32 %v1358_v38, %v644_v56 }
 0x16e   : > { %v810_v20 = vpop.permute.xlu1 %809  ;;  %v904_v15 = vadd.f32 %v1375_v12, %v774_v52 }
 0x16f   : > { %vm846_vm8 = vcmp.eq.s32.totalorder %v810_v20, %v2087_v43  ;;  %v909_v20 = vld [vmem:[#allocation2 + $0x50] sm:$0xff] }
 0x170   : > { %v1365_v46 = vsel %vm846_vm8, 1.0, %v1679_v31 }
 0x171   : > { %v894_v14 = vadd.f32 %v1365_v46, %v764_v37 }
 0x172   : > { %v831_v28 = vpop.permute.xlu1 %830 }
 0x173   : > { %vm853_vm11 = vcmp.eq.s32.totalorder %v831_v28, %v2087_v43  ;;  %v923_v53 = vpack.c.bf16 %v894_v14, %v893_v26  ;;  %v917_v14 = vld [vmem:[#allocation2 + $0x60] sm:$0xff] }
 0x174   : > { %v1372_v18 = vsel %vm853_vm11, 1.0, %v1679_v31 }
 0x175   : > { %v901_v41 = vadd.f32 %v1372_v18, %v771_v45  ;;  %1428 = vmatprep.mubr.bf16.mxu0 %v923_v53  ;;  %v920_v45 = vld [vmem:[#allocation2 + $0x28] sm:$0xff] }
 0x176   : > { %v813_v33 = vpop.permute.xlu1 %812 }
 0x177   : > { %vm847_vm13 = vcmp.eq.s32.totalorder %v813_v33, %v2087_v43  ;;  %v927_v10 = vpack.c.bf16 %v902_v25, %v901_v41 }
 0x178   : > { %v1366_v7 = vsel %vm847_vm13, 1.0, %v1679_v31 }
 0x179   : > { %v895_v37 = vadd.f32 %v1366_v7, %v2339_v2  ;;  %1436 = vmatprep.mubr.bf16.mxu1 %v927_v10 }
 0x17a   : > { %v837_v58 = vpop.permute.xlu1 %836 }
 0x17b   : > { %vm855_vm15 = vcmp.eq.s32.totalorder %v837_v58, %v2087_v43  ;;  %v924_v16 = vpack.c.bf16 %v896_v1, %v895_v37 }
 0x17c   : > { %v1374_v6 = vsel %vm855_vm15, 1.0, %v1679_v31 }
 0x17d   : > { %v903_v36 = vadd.f32 %v1374_v6, %v2343_v59  ;;  %1429 = vmatmul.mubr.bf16.gmra.mxu0 %v924_v16 }
 0x17f   : > { %v928_v50 = vpack.c.bf16 %v904_v15, %v903_v36 }
 0x181   : > { %1437 = vmatmul.mubr.bf16.gmra.mxu1 %v928_v50 }
 0x1f4   : > { %v1426_v8 = vpop.f32.mrf.mxu0 }
 0x1f5   : > { %v1092_v32 = vadd.f32 %v1426_v8, %v907_v62 }
 0x1f6   : > { %v1027_v2 = vpop.f32.mrf.mxu0 }
 0x1f7   : > { %1108 = vst [vmem:[#allocation2 + $0x58] sm:$0xff] %v1092_v32  ;;  %v1090_v43 = vadd.f32 %v1027_v2, %v905_v30 }
 0x1f8   : > { %v1427_v23 = vpop.f32.mrf.mxu0  ;;  %v1434_v21 = vpop.f32.mrf.mxu1 }
 0x1f9   : > { %1106 = vst [vmem:[#allocation2 + $0x30] sm:$0xff] %v1090_v43  ;;  %v1093_v31 = vadd.f32 %v1427_v23, %v908_v5  ;;  %v1100_v48 = vadd.f32 %v1434_v21, %v915_v60 }
 0x1fa   : > { %v1030_v59 = vpop.f32.mrf.mxu0  ;;  %v1059_v54 = vpop.f32.mrf.mxu1 }
 0x1fb   : > { %1109 = vst [vmem:[#allocation2 + $0x18] sm:$0xff] %v1093_v31  ;;  %1116 = vst [vmem:[#allocation2 + $0x10] sm:$0xff] %v1100_v48  ;;  %v1091_v44 = vadd.f32 %v1030_v59, %v906_v47  ;;  %v1098_v61 = vadd.f32 %v1059_v54, %v913_v0 }
 0x1fc   : > { %v1435_v3 = vpop.f32.mrf.mxu1 }
 0x1fd   : > { %1107 = vst [vmem:[#allocation2] sm:$0xff] %v1091_v44  ;;  %1114 = vst [vmem:[#allocation2 + $0x40] sm:$0xff] %v1098_v61  ;;  %v1101_v29 = vadd.f32 %v1435_v3, %v916_v27 }
 0x1fe   : > { %v1062_v55 = vpop.f32.mrf.mxu1 }
 0x1ff   : > { %1117 = vst [vmem:[#allocation2 + $0x38] sm:$0xff] %v1101_v29  ;;  %v1099_v39 = vadd.f32 %v1062_v55, %v914_v35 }
 0x201   : > { %1115 = vst [vmem:[#allocation2 + $0x20] sm:$0xff] %v1099_v39 }
 0x23d   : > { %v1430_v17 = vpop.f32.mrf.mxu0 }
 0x23e   : > { %v1096_v63 = vadd.f32 %v1430_v17, %v911_v42 }
 0x23f   : > { %v1043_v57 = vpop.f32.mrf.mxu0 }
 0x240   : > { %1112 = vst [vmem:[#allocation2 + $0x8] sm:$0xff] %v1096_v63  ;;  %v1094_v46 = vadd.f32 %v1043_v57, %v909_v20 }
 0x241   : > { %v1431_v11 = vpop.f32.mrf.mxu0  ;;  %v1438_v26 = vpop.f32.mrf.mxu1 }
 0x242   : > { %1110 = vst [vmem:[#allocation2 + $0x50] sm:$0xff] %v1094_v46  ;;  %v1097_v9 = vadd.f32 %v1431_v11, %v912_v34  ;;  %v1104_v13 = vadd.f32 %v1438_v26, %v919_v19 }
 0x243   : > { %v1046_v49 = vpop.f32.mrf.mxu0  ;;  %v1075_v28 = vpop.f32.mrf.mxu1 }
 0x244   : > { %1113 = vst [vmem:[#allocation2 + $0x48] sm:$0xff] %v1097_v9  ;;  %1120 = vst [vmem:[#allocation2 + $0x78] sm:$0xff] %v1104_v13  ;;  %v1095_v53 = vadd.f32 %v1046_v49, %v910_v4  ;;  %v1102_v18 = vadd.f32 %v1075_v28, %v917_v14 }
 0x245   : > { %v1439_v25 = vpop.f32.mrf.mxu1 }
 0x246   : > { %1111 = vst [vmem:[#allocation2 + $0x68] sm:$0xff] %v1095_v53  ;;  %1118 = vst [vmem:[#allocation2 + $0x60] sm:$0xff] %v1102_v18  ;;  %v1105_v41 = vadd.f32 %v1439_v25, %v920_v45  ;;  %1125 = sbr.rel (%p1384_p6) target bundleno = 598 (0x256), region = 40 }
 0x247   : > { %v1078_v24 = vpop.f32.mrf.mxu1 }
 0x248   : > { %1121 = vst [vmem:[#allocation2 + $0x28] sm:$0xff] %v1105_v41  ;;  %v1103_v40 = vadd.f32 %v1078_v24, %v918_v22 }
 0x24a   : > { %1119 = vst [vmem:[#allocation2 + $0x70] sm:$0xff] %v1103_v40 }
 0x24b   : > { %v1126_v38 = vld [vmem:[#allocation2 + $0x30] sm:$0xff]  ;;  %v1385_v33 = vld [vmem:[%s2477_s3] ss:$0 sm:$0xff]  ;;  %v1128_v7 = vld [vmem:[#allocation2 + $0x58] sm:$0xff] }
 0x24c   : > { %v1127_v56 = vld [vmem:[#allocation2] sm:$0xff]  ;;  %v1149_v10 = vadd.f32 %v1385_v33, %v1126_v38  ;;  %v1129_v1 = vld [vmem:[#allocation2 + $0x18] sm:$0xff]  ;;  %v1130_v52 = vld [vmem:[#allocation2 + $0x50] sm:$0xff]  ;;  %v1151_v37 = vadd.f32 %v1385_v33, %v1128_v7 }
 0x24d   : > { %v1150_v51 = vadd.f32 %v1385_v33, %v1127_v56  ;;  %v1152_v58 = vadd.f32 %v1385_v33, %v1129_v1  ;;  %v1153_v16 = vadd.f32 %v1385_v33, %v1130_v52  ;;  %v1131_v12 = vld [vmem:[#allocation2 + $0x68] sm:$0xff]  ;;  %v1134_v8 = vld [vmem:[#allocation2 + $0x40] sm:$0xff]  ;;  %v1136_v32 = vld [vmem:[#allocation2 + $0x10] sm:$0xff] }
 0x24e   : > { %v1132_v6 = vld [vmem:[#allocation2 + $0x8] sm:$0xff]  ;;  %1165 = vst [vmem:[%s1795_s7] sm:$0xff] %v1149_v10  ;;  %v1154_v36 = vadd.f32 %v1385_v33, %v1131_v12  ;;  %v1135_v30 = vld [vmem:[#allocation2 + $0x20] sm:$0xff]  ;;  %1167 = vst [vmem:[%s1795_s7 + $0x10] sm:$0xff] %v1151_v37  ;;  %v1157_v2 = vadd.f32 %v1385_v33, %v1134_v8  ;;  %v1159_v60 = vadd.f32 %v1385_v33, %v1136_v32 }
 0x24f   : > { %v1133_v15 = vld [vmem:[#allocation2 + $0x48] sm:$0xff]  ;;  %1166 = vst [vmem:[%s1795_s7 + $0x8] sm:$0xff] %v1150_v51  ;;  %v1155_v50 = vadd.f32 %v1385_v33, %v1132_v6  ;;  %1168 = vst [vmem:[%s1795_s7 + $0x18] sm:$0xff] %v1152_v58  ;;  %v1158_v5 = vadd.f32 %v1385_v33, %v1135_v30  ;;  %v1137_v43 = vld [vmem:[#allocation2 + $0x38] sm:$0xff] }
 0x250   : > { %v1156_v62 = vadd.f32 %v1385_v33, %v1133_v15  ;;  %1169 = vst [vmem:[%s1795_s7 + $0x20] sm:$0xff] %v1153_v16  ;;  %v1138_v23 = vld [vmem:[#allocation2 + $0x60] sm:$0xff]  ;;  %1170 = vst [vmem:[%s1795_s7 + $0x28] sm:$0xff] %v1154_v36  ;;  %v1160_v47 = vadd.f32 %v1385_v33, %v1137_v43  ;;  %v1140_v48 = vld [vmem:[#allocation2 + $0x78] sm:$0xff] }
 0x251   : > { %v1139_v21 = vld [vmem:[#allocation2 + $0x70] sm:$0xff]  ;;  %1171 = vst [vmem:[%s1795_s7 + $0x30] sm:$0xff] %v1155_v50  ;;  %v1161_v0 = vadd.f32 %v1385_v33, %v1138_v23  ;;  %v1141_v59 = vld [vmem:[#allocation2 + $0x28] sm:$0xff]  ;;  %1173 = vst [vmem:[%s1795_s7 + $0x40] sm:$0xff] %v1157_v2  ;;  %v1163_v54 = vadd.f32 %v1385_v33, %v1140_v48 }
 0x252   : > { %1172 = vst [vmem:[%s1795_s7 + $0x38] sm:$0xff] %v1156_v62  ;;  %v1162_v31 = vadd.f32 %v1385_v33, %v1139_v21  ;;  %1174 = vst [vmem:[%s1795_s7 + $0x48] sm:$0xff] %v1158_v5  ;;  %v1164_v27 = vadd.f32 %v1385_v33, %v1141_v59 }
 0x253   : > { %1175 = vst [vmem:[%s1795_s7 + $0x50] sm:$0xff] %v1159_v60  ;;  %1176 = vst [vmem:[%s1795_s7 + $0x58] sm:$0xff] %v1160_v47 }
 0x254   : > { %1177 = vst [vmem:[%s1795_s7 + $0x60] sm:$0xff] %v1161_v0  ;;  %1178 = vst [vmem:[%s1795_s7 + $0x68] sm:$0xff] %v1162_v31 }
 0x255   : > { %1179 = vst [vmem:[%s1795_s7 + $0x70] sm:$0xff] %v1163_v54  ;;  %1180 = vst [vmem:[%s1795_s7 + $0x78] sm:$0xff] %v1164_v27 }
 0x256 PF: > { %s1391_s22 = sshll.u32 %s1658_s23, 11  ;;  %s1195_s28 = sshll.u32 %s1795_s7, 4  ;;  %s2419_s28 = int_to_ptr.vmem [resolvable:$true] %s1195_s28 }
 0x257   : > { %s2416_s27 = scalar_lea.hbm %s2478_s4, %s1391_s22  ;;  %s2423_s8 = scalar_lea.sflag [#allocation6], %s197_s10 }
 0x258   : > { %s1576_s11 = scalar_lea.vmem %s2419_s28, 2048  ;;  %s1680_s23 = smov [#allocation5]  }
 0x259   : > { %p1577_p7 = scmp.ne.s32.totalorder %s2419_s28, %s1576_s11  ;;  %s1580_s12 = sshll.u32 %s1680_s23, 4  ;;  %s1581_s12 = int_to_ptr.vmem [resolvable:$false] %s1580_s12 }
 0x25a   : > { %s1582_s13 = scalar_lea.vmem %s1581_s12, 4096  ;;  %p1583_p11 = scmp.lt.s32.totalorder %s2419_s28, %s1581_s12 }
 0x25b   : > { %p1578_p9 = pnand %p1577_p7, %p1760_p8  ;;  %p1584_p12 = scmp.lt.s32.totalorder %s1582_s13, %s1576_s11 }
 0x25d   : > { %p1579_p10 = pneg %p1578_p9  ;;  %p1585_p13 = por %p1584_p12, %p1583_p11 }
 0x25f   : > { %p1586_p1 = pnand %p1585_p13, %p1579_p10 }
 0x261   : > { %1589 = shalt.err (!%p1586_p1)
}
 0x262   : > { %s1590_s10 = scalar_lea.hbm %s2416_s27, 2048  ;;  %s1594_s15 = scalar_lea.hbm %s2478_s4, 4096 }
 0x263   : > { %p1591_p2 = scmp.ne.s32.totalorder %s2416_s27, %s1590_s10  ;;  %p1595_p5 = scmp.lt.s32.totalorder %s2416_s27, %s2478_s4 }
 0x264   : > { %p1596_p6 = scmp.lt.s32.totalorder %s1594_s15, %s1590_s10 }
 0x265   : > { %p1592_p3 = pnand %p1591_p2, %p1760_p8 }
 0x266   : > { %p1597_p7 = por %p1596_p6, %p1595_p5 }
 0x267   : > { %p1593_p4 = pneg %p1592_p3 }
 0x269   : > { %p1598_p9 = pnand %p1597_p7, %p1593_p4 }
 0x26b   : > { %1601 = shalt.err (!%p1598_p9)
}
 0x26c   : > { %s1681_s22 = smov 128   ;;  %s1682_s18 = smov 8  }
 0x26d   : > { %1456 = dma.vmem_to_hbm [thread:$0]  (%p1760_p8), %s2419_s28, 2048, %s2416_s27, %s2423_s8, %s1681_s22, %s1681_s22, %s1682_s18  }
 0x26e PF: > { %p1462_p10 = scmp.ge.s32.totalorder %s1670_s26, 2  ;;  %s1210_s19 = sand.u32 1, %s1642_s20  }
 0x26f   : > { %s1211_s11 = scalar_lea.sflag [#allocation6], %s1210_s19 }
 0x270   : > { %p1459_p11 = pnand %p1462_p10, %p1770_p0 }
 0x272   : > { %p1460_p12 = pneg %p1459_p11 }
 0x274   : > { %1637 = dma.done.wait (%p1460_p12), %s1211_s11, 2048  }
 0x275   : > { %1639 = vsyncadd (%p1460_p12), %s1211_s11, 4294965248  ;;  %s23_s26 = sadd.s32 1, %s1670_s26   ;;  %s2481_s20 = smov %s1646_s21 }
 0x276   : > { %p20_p13 = scmp.ge.s32.totalorder %s23_s26, 8   ;;  %s2482_s21 = smov %s1650_s0 }
 0x277   : > { %s2483_s0 = smov %s1778_s9  ;;  %s2484_s22 = smov %s1662_s24 }
 0x278   : > { %s2485_s23 = smov %s1666_s25  ;;  %s2486_s24 = smov %s2489_s29 }
 0x279   : > { %s2487_s25 = smov %s2493_s30  ;;  %22 = sbr.rel (!%p20_p13) target bundleno = 20 (0x14), region = 78 }
 0x27e   :  { %1216 = vsyncpa [#allocation6], 1 }
 0x27f   :  { %1218 = vsyncpa [#allocation6 + $0x1], 1 }

</bundles_post_ra>
